<compile_context>
chip_gen: v5e
topology: v5e:2x2
jax: 0.10.0
libtpu: 0.0.40
codegen_flags: <defaults>
</compile_context>

<pallas_src>
import functools

import numpy as np
import jax
import jax.numpy as jnp
from jax import lax
from jax.experimental import pallas as pl
from jax.experimental.pallas import tpu as pltpu


def _s_attention_kernel(x_ref, mask_ref, w_ref, b_ref, out_ref, attn_ref,
                        *, C, K, W, HW):
    # x_ref   : (TB, C, HW) VMEM
    # mask_ref: (K*K, HW)   VMEM  (1.0 where the tap is in-bounds, else 0.0)
    # w_ref   : (C*K*K,)    SMEM  (index c*K*K + dy*K + dx, matches OIHW reshape)
    # b_ref   : (1,)        SMEM
    # out_ref : (TB, C, HW) VMEM
    # attn_ref: (TB, 1, HW) VMEM
    KK = K * K
    P = (K - 1) // 2

    x = x_ref[...].astype(jnp.float32)              # (TB, C, HW)
    masks = mask_ref[...]                           # (KK, HW)
    x_ch = [x[:, c, :] for c in range(C)]           # C planes of (TB, HW)

    acc = jnp.zeros(x_ch[0].shape, dtype=jnp.float32) + b_ref[0]

    for dy in range(K):
        for dx in range(K):
            t = dy * K + dx
            # Channel reduction first: the spatial shift is channel-independent.
            plane = x_ch[0] * w_ref[0 * KK + t]
            for c in range(1, C):
                plane = plane + x_ch[c] * w_ref[c * KK + t]
            if dy == P and dx == P:
                acc = acc + plane                   # center tap: no shift, no mask
            else:
                d = (dy - P) * W + (dx - P)         # flattened spatial offset
                # rolled[p] = plane[(p + d) % HW]; wrap-around is zeroed by the mask.
                rolled = pltpu.roll(plane, shift=(-d) % HW, axis=1)
                acc = acc + rolled * masks[t:t + 1]

    attn = jax.nn.sigmoid(acc) * 0.5 + 0.5          # (TB, HW), f32

    out_ref[...] = (x * attn[:, None, :]).astype(out_ref.dtype)
    attn_ref[...] = attn[:, None, :].astype(attn_ref.dtype)


def _pick_tile_b(B, C, HW, itemsize):
    """Largest batch tile fitting ~12 MiB per step, preferring >=2 grid steps."""
    per_image = (2 * C + 1) * HW * itemsize         # x + out + attn per image
    budget = 12 * 1024 * 1024
    max_tb = max(1, budget // max(per_image, 1))
    divisors = [d for d in range(1, B + 1) if B % d == 0 and d <= max_tb]
    if not divisors:
        return 1
    pref = [d for d in divisors if B // d >= 2]     # keep both v7x TCs busy
    return max(pref) if pref else max(divisors)


def s_attention_forward(x, weight, bias, kernel_size):
    """x: (B, C, H, W); weight: (1, C, K, K); bias: (1,).

    Returns (output, attn) matching PyTorch S_Attention.forward:
    output (B, C, H, W), attn (B, 1, H, W).
    """
    B, C, H, W = x.shape
    K = int(kernel_size)
    assert K % 2 == 1, "only odd kernel sizes reproduce PyTorch 'same' padding"
    P = (K - 1) // 2
    HW = H * W
    KK = K * K

    # Free, contiguous reshape: the lane axis becomes H*W (dense) instead of W.
    x_flat = x.reshape(B, C, HW)
    w_flat = weight.reshape(C * KK).astype(jnp.float32)
    b_flat = bias.reshape(1).astype(jnp.float32)

    # Edge-validity masks per tap, built on host (compile-time constants).
    row = np.arange(H)
    col = np.arange(W)
    mlist = []
    for dy in range(K):
        for dx in range(K):
            dh, dw = dy - P, dx - P
            mrow = (row + dh >= 0) & (row + dh < H)
            mcol = (col + dw >= 0) & (col + dw < W)
            mlist.append((mrow[:, None] & mcol[None, :]).reshape(HW))
    masks = jnp.asarray(np.stack(mlist).astype(np.float32))      # (K*K, HW)

    tile_b = _pick_tile_b(B, C, HW, x.dtype.itemsize)
    grid = (B // tile_b,)

    per_step = tile_b * (2 * C + 1) * HW * x.dtype.itemsize + KK * HW * 4
    vmem_limit = int(min(56 * 2**20, max(32 * 2**20, 4 * per_step)))

    kernel = functools.partial(_s_attention_kernel, C=C, K=K, W=W, HW=HW)

    out_flat, attn_flat = pl.pallas_call(
        kernel,
        out_shape=(
            jax.ShapeDtypeStruct((B, C, HW), x.dtype),
            jax.ShapeDtypeStruct((B, 1, HW), x.dtype),
        ),
        grid=grid,
        in_specs=[
            pl.BlockSpec((tile_b, C, HW), lambda b: (b, 0, 0)),
            pl.BlockSpec((KK, HW), lambda b: (0, 0)),
            pl.BlockSpec(memory_space=pltpu.SMEM),
            pl.BlockSpec(memory_space=pltpu.SMEM),
        ],
        out_specs=(
            pl.BlockSpec((tile_b, C, HW), lambda b: (b, 0, 0)),
            pl.BlockSpec((tile_b, 1, HW), lambda b: (b, 0, 0)),
        ),
        compiler_params=pltpu.CompilerParams(
            dimension_semantics=("parallel",),
            vmem_limit_bytes=vmem_limit,
        ),
    )(x_flat, masks, w_flat, b_flat)

    # NOTE: for very large C*H*W (v7x's 64 MiB VMEM) an extra H-tile grid axis
    # with a P-row halo would be needed; not required at these shapes.
    return out_flat.reshape(B, C, H, W), attn_flat.reshape(B, 1, H, W)


def _reference(x, weight, bias):
    """Pure-JAX reference matching nn.Conv2d + 0.5*sigmoid + 0.5 gating."""
    conv = lax.conv_general_dilated(
        x, weight, window_strides=(1, 1), padding="SAME",
        dimension_numbers=("NCHW", "OIHW", "NCHW"),
    ) + bias.reshape(1, 1, 1, 1)
    attn = 0.5 * jax.nn.sigmoid(conv) + 0.5
    return x * attn, attn


if __name__ == "__main__":
    B, C, H, W = 2, 4, 16, 16
    K = 3

    key = jax.random.PRNGKey(0)
    kx, kw, kb = jax.random.split(key, 3)
    x = jax.random.normal(kx, (B, C, H, W), dtype=jnp.float32)
    weight = jax.random.normal(kw, (1, C, K, K), dtype=jnp.float32) * 0.1
    bias = jax.random.normal(kb, (1,), dtype=jnp.float32) * 0.1

    out, attn = s_attention_forward(x, weight, bias, K)
    out = jax.block_until_ready(out)
    attn = jax.block_until_ready(attn)

    ref_out, ref_attn = _reference(x, weight, bias)
    assert jnp.allclose(out, ref_out, rtol=1e-5, atol=1e-5)
    assert jnp.allclose(attn, ref_attn, rtol=1e-5, atol=1e-5)

    print("KERNEL_OK")
</pallas_src>

<mosaic_0001>
module attributes {stable_mosaic.version = 11 : i64} {
  func.func @_s_attention_kernel(%arg0: i32, %arg1: memref<1x4x256xf32, #tpu.memory_space<vmem>>, %arg2: memref<9x256xf32, #tpu.memory_space<vmem>>, %arg3: memref<36xf32, #tpu.memory_space<smem>>, %arg4: memref<1xf32, #tpu.memory_space<smem>>, %arg5: memref<1x4x256xf32, #tpu.memory_space<vmem>>, %arg6: memref<1x1x256xf32, #tpu.memory_space<vmem>>) attributes {dimension_semantics = [#tpu.dimension_semantics<parallel>], iteration_bounds = array<i64: 2>, scalar_prefetch = 0 : i64, scratch_operands = 0 : i64, tpu.core_type = #tpu.core_type<tc>, window_params = [{transform_indices = @transform_0, window_bounds = array<i64: 1, 4, 256>}, {pipeline_mode = #tpu.pipeline_mode<synchronous>, transform_indices = @transform_1, window_bounds = array<i64: 9, 256>}, {transform_indices = @transform_2, window_bounds = array<i64: 36>}, {transform_indices = @transform_3, window_bounds = array<i64: 1>}, {transform_indices = @transform_4, window_bounds = array<i64: 1, 4, 256>}, {transform_indices = @transform_5, window_bounds = array<i64: 1, 1, 256>}]} {
    %c0 = arith.constant 0 : index
    %c0_0 = arith.constant 0 : index
    %c0_1 = arith.constant 0 : index
    %0 = vector.load %arg1[%c0, %c0_0, %c0_1] : memref<1x4x256xf32, #tpu.memory_space<vmem>>, vector<1x4x256xf32>
    %c0_2 = arith.constant 0 : index
    %c0_3 = arith.constant 0 : index
    %1 = vector.load %arg2[%c0_2, %c0_3] : memref<9x256xf32, #tpu.memory_space<vmem>>, vector<9x256xf32>
    %2 = vector.extract_strided_slice %0 {offsets = [0, 0, 0], sizes = [1, 1, 256], strides = [1, 1, 1]} : vector<1x4x256xf32> to vector<1x1x256xf32>
    %3 = vector.shape_cast %2 : vector<1x1x256xf32> to vector<1x256xf32>
    %4 = vector.extract_strided_slice %0 {offsets = [0, 1, 0], sizes = [1, 1, 256], strides = [1, 1, 1]} : vector<1x4x256xf32> to vector<1x1x256xf32>
    %5 = vector.shape_cast %4 : vector<1x1x256xf32> to vector<1x256xf32>
    %6 = vector.extract_strided_slice %0 {offsets = [0, 2, 0], sizes = [1, 1, 256], strides = [1, 1, 1]} : vector<1x4x256xf32> to vector<1x1x256xf32>
    %7 = vector.shape_cast %6 : vector<1x1x256xf32> to vector<1x256xf32>
    %8 = vector.extract_strided_slice %0 {offsets = [0, 3, 0], sizes = [1, 1, 256], strides = [1, 1, 1]} : vector<1x4x256xf32> to vector<1x1x256xf32>
    %9 = vector.shape_cast %8 : vector<1x1x256xf32> to vector<1x256xf32>
    %cst = arith.constant 0.000000e+00 : f32
    %10 = vector.broadcast %cst : f32 to vector<1x256xf32>
    %c0_4 = arith.constant 0 : index
    %11 = memref.load %arg4[%c0_4] : memref<1xf32, #tpu.memory_space<smem>>
    %12 = vector.broadcast %11 : f32 to vector<1x256xf32>
    %13 = arith.addf %10, %12 : vector<1x256xf32>
    %c0_5 = arith.constant 0 : index
    %14 = memref.load %arg3[%c0_5] : memref<36xf32, #tpu.memory_space<smem>>
    %15 = vector.broadcast %14 : f32 to vector<1x256xf32>
    %16 = arith.mulf %3, %15 : vector<1x256xf32>
    %c9 = arith.constant 9 : index
    %17 = memref.load %arg3[%c9] : memref<36xf32, #tpu.memory_space<smem>>
    %18 = vector.broadcast %17 : f32 to vector<1x256xf32>
    %19 = arith.mulf %5, %18 : vector<1x256xf32>
    %20 = arith.addf %16, %19 : vector<1x256xf32>
    %c18 = arith.constant 18 : index
    %21 = memref.load %arg3[%c18] : memref<36xf32, #tpu.memory_space<smem>>
    %22 = vector.broadcast %21 : f32 to vector<1x256xf32>
    %23 = arith.mulf %7, %22 : vector<1x256xf32>
    %24 = arith.addf %20, %23 : vector<1x256xf32>
    %c27 = arith.constant 27 : index
    %25 = memref.load %arg3[%c27] : memref<36xf32, #tpu.memory_space<smem>>
    %26 = vector.broadcast %25 : f32 to vector<1x256xf32>
    %27 = arith.mulf %9, %26 : vector<1x256xf32>
    %28 = arith.addf %24, %27 : vector<1x256xf32>
    %c17_i32 = arith.constant 17 : i32
    %29 = tpu.dynamic_rotate %28 by %c17_i32 dim 1 : vector<1x256xf32>, i32 -> vector<1x256xf32>
    %30 = vector.extract_strided_slice %1 {offsets = [0, 0], sizes = [1, 256], strides = [1, 1]} : vector<9x256xf32> to vector<1x256xf32>
    %31 = arith.mulf %29, %30 : vector<1x256xf32>
    %32 = arith.addf %13, %31 : vector<1x256xf32>
    %c1 = arith.constant 1 : index
    %33 = memref.load %arg3[%c1] : memref<36xf32, #tpu.memory_space<smem>>
    %34 = vector.broadcast %33 : f32 to vector<1x256xf32>
    %35 = arith.mulf %3, %34 : vector<1x256xf32>
    %c10 = arith.constant 10 : index
    %36 = memref.load %arg3[%c10] : memref<36xf32, #tpu.memory_space<smem>>
    %37 = vector.broadcast %36 : f32 to vector<1x256xf32>
    %38 = arith.mulf %5, %37 : vector<1x256xf32>
    %39 = arith.addf %35, %38 : vector<1x256xf32>
    %c19 = arith.constant 19 : index
    %40 = memref.load %arg3[%c19] : memref<36xf32, #tpu.memory_space<smem>>
    %41 = vector.broadcast %40 : f32 to vector<1x256xf32>
    %42 = arith.mulf %7, %41 : vector<1x256xf32>
    %43 = arith.addf %39, %42 : vector<1x256xf32>
    %c28 = arith.constant 28 : index
    %44 = memref.load %arg3[%c28] : memref<36xf32, #tpu.memory_space<smem>>
    %45 = vector.broadcast %44 : f32 to vector<1x256xf32>
    %46 = arith.mulf %9, %45 : vector<1x256xf32>
    %47 = arith.addf %43, %46 : vector<1x256xf32>
    %c16_i32 = arith.constant 16 : i32
    %48 = tpu.dynamic_rotate %47 by %c16_i32 dim 1 : vector<1x256xf32>, i32 -> vector<1x256xf32>
    %49 = vector.extract_strided_slice %1 {offsets = [1, 0], sizes = [1, 256], strides = [1, 1]} : vector<9x256xf32> to vector<1x256xf32>
    %50 = arith.mulf %48, %49 : vector<1x256xf32>
    %51 = arith.addf %32, %50 : vector<1x256xf32>
    %c2 = arith.constant 2 : index
    %52 = memref.load %arg3[%c2] : memref<36xf32, #tpu.memory_space<smem>>
    %53 = vector.broadcast %52 : f32 to vector<1x256xf32>
    %54 = arith.mulf %3, %53 : vector<1x256xf32>
    %c11 = arith.constant 11 : index
    %55 = memref.load %arg3[%c11] : memref<36xf32, #tpu.memory_space<smem>>
    %56 = vector.broadcast %55 : f32 to vector<1x256xf32>
    %57 = arith.mulf %5, %56 : vector<1x256xf32>
    %58 = arith.addf %54, %57 : vector<1x256xf32>
    %c20 = arith.constant 20 : index
    %59 = memref.load %arg3[%c20] : memref<36xf32, #tpu.memory_space<smem>>
    %60 = vector.broadcast %59 : f32 to vector<1x256xf32>
    %61 = arith.mulf %7, %60 : vector<1x256xf32>
    %62 = arith.addf %58, %61 : vector<1x256xf32>
    %c29 = arith.constant 29 : index
    %63 = memref.load %arg3[%c29] : memref<36xf32, #tpu.memory_space<smem>>
    %64 = vector.broadcast %63 : f32 to vector<1x256xf32>
    %65 = arith.mulf %9, %64 : vector<1x256xf32>
    %66 = arith.addf %62, %65 : vector<1x256xf32>
    %c15_i32 = arith.constant 15 : i32
    %67 = tpu.dynamic_rotate %66 by %c15_i32 dim 1 : vector<1x256xf32>, i32 -> vector<1x256xf32>
    %68 = vector.extract_strided_slice %1 {offsets = [2, 0], sizes = [1, 256], strides = [1, 1]} : vector<9x256xf32> to vector<1x256xf32>
    %69 = arith.mulf %67, %68 : vector<1x256xf32>
    %70 = arith.addf %51, %69 : vector<1x256xf32>
    %c3 = arith.constant 3 : index
    %71 = memref.load %arg3[%c3] : memref<36xf32, #tpu.memory_space<smem>>
    %72 = vector.broadcast %71 : f32 to vector<1x256xf32>
    %73 = arith.mulf %3, %72 : vector<1x256xf32>
    %c12 = arith.constant 12 : index
    %74 = memref.load %arg3[%c12] : memref<36xf32, #tpu.memory_space<smem>>
    %75 = vector.broadcast %74 : f32 to vector<1x256xf32>
    %76 = arith.mulf %5, %75 : vector<1x256xf32>
    %77 = arith.addf %73, %76 : vector<1x256xf32>
    %c21 = arith.constant 21 : index
    %78 = memref.load %arg3[%c21] : memref<36xf32, #tpu.memory_space<smem>>
    %79 = vector.broadcast %78 : f32 to vector<1x256xf32>
    %80 = arith.mulf %7, %79 : vector<1x256xf32>
    %81 = arith.addf %77, %80 : vector<1x256xf32>
    %c30 = arith.constant 30 : index
    %82 = memref.load %arg3[%c30] : memref<36xf32, #tpu.memory_space<smem>>
    %83 = vector.broadcast %82 : f32 to vector<1x256xf32>
    %84 = arith.mulf %9, %83 : vector<1x256xf32>
    %85 = arith.addf %81, %84 : vector<1x256xf32>
    %c1_i32 = arith.constant 1 : i32
    %86 = tpu.dynamic_rotate %85 by %c1_i32 dim 1 : vector<1x256xf32>, i32 -> vector<1x256xf32>
    %87 = vector.extract_strided_slice %1 {offsets = [3, 0], sizes = [1, 256], strides = [1, 1]} : vector<9x256xf32> to vector<1x256xf32>
    %88 = arith.mulf %86, %87 : vector<1x256xf32>
    %89 = arith.addf %70, %88 : vector<1x256xf32>
    %c4 = arith.constant 4 : index
    %90 = memref.load %arg3[%c4] : memref<36xf32, #tpu.memory_space<smem>>
    %91 = vector.broadcast %90 : f32 to vector<1x256xf32>
    %92 = arith.mulf %3, %91 : vector<1x256xf32>
    %c13 = arith.constant 13 : index
    %93 = memref.load %arg3[%c13] : memref<36xf32, #tpu.memory_space<smem>>
    %94 = vector.broadcast %93 : f32 to vector<1x256xf32>
    %95 = arith.mulf %5, %94 : vector<1x256xf32>
    %96 = arith.addf %92, %95 : vector<1x256xf32>
    %c22 = arith.constant 22 : index
    %97 = memref.load %arg3[%c22] : memref<36xf32, #tpu.memory_space<smem>>
    %98 = vector.broadcast %97 : f32 to vector<1x256xf32>
    %99 = arith.mulf %7, %98 : vector<1x256xf32>
    %100 = arith.addf %96, %99 : vector<1x256xf32>
    %c31 = arith.constant 31 : index
    %101 = memref.load %arg3[%c31] : memref<36xf32, #tpu.memory_space<smem>>
    %102 = vector.broadcast %101 : f32 to vector<1x256xf32>
    %103 = arith.mulf %9, %102 : vector<1x256xf32>
    %104 = arith.addf %100, %103 : vector<1x256xf32>
    %105 = arith.addf %89, %104 : vector<1x256xf32>
    %c5 = arith.constant 5 : index
    %106 = memref.load %arg3[%c5] : memref<36xf32, #tpu.memory_space<smem>>
    %107 = vector.broadcast %106 : f32 to vector<1x256xf32>
    %108 = arith.mulf %3, %107 : vector<1x256xf32>
    %c14 = arith.constant 14 : index
    %109 = memref.load %arg3[%c14] : memref<36xf32, #tpu.memory_space<smem>>
    %110 = vector.broadcast %109 : f32 to vector<1x256xf32>
    %111 = arith.mulf %5, %110 : vector<1x256xf32>
    %112 = arith.addf %108, %111 : vector<1x256xf32>
    %c23 = arith.constant 23 : index
    %113 = memref.load %arg3[%c23] : memref<36xf32, #tpu.memory_space<smem>>
    %114 = vector.broadcast %113 : f32 to vector<1x256xf32>
    %115 = arith.mulf %7, %114 : vector<1x256xf32>
    %116 = arith.addf %112, %115 : vector<1x256xf32>
    %c32 = arith.constant 32 : index
    %117 = memref.load %arg3[%c32] : memref<36xf32, #tpu.memory_space<smem>>
    %118 = vector.broadcast %117 : f32 to vector<1x256xf32>
    %119 = arith.mulf %9, %118 : vector<1x256xf32>
    %120 = arith.addf %116, %119 : vector<1x256xf32>
    %c255_i32 = arith.constant 255 : i32
    %121 = tpu.dynamic_rotate %120 by %c255_i32 dim 1 : vector<1x256xf32>, i32 -> vector<1x256xf32>
    %122 = vector.extract_strided_slice %1 {offsets = [5, 0], sizes = [1, 256], strides = [1, 1]} : vector<9x256xf32> to vector<1x256xf32>
    %123 = arith.mulf %121, %122 : vector<1x256xf32>
    %124 = arith.addf %105, %123 : vector<1x256xf32>
    %c6 = arith.constant 6 : index
    %125 = memref.load %arg3[%c6] : memref<36xf32, #tpu.memory_space<smem>>
    %126 = vector.broadcast %125 : f32 to vector<1x256xf32>
    %127 = arith.mulf %3, %126 : vector<1x256xf32>
    %c15 = arith.constant 15 : index
    %128 = memref.load %arg3[%c15] : memref<36xf32, #tpu.memory_space<smem>>
    %129 = vector.broadcast %128 : f32 to vector<1x256xf32>
    %130 = arith.mulf %5, %129 : vector<1x256xf32>
    %131 = arith.addf %127, %130 : vector<1x256xf32>
    %c24 = arith.constant 24 : index
    %132 = memref.load %arg3[%c24] : memref<36xf32, #tpu.memory_space<smem>>
    %133 = vector.broadcast %132 : f32 to vector<1x256xf32>
    %134 = arith.mulf %7, %133 : vector<1x256xf32>
    %135 = arith.addf %131, %134 : vector<1x256xf32>
    %c33 = arith.constant 33 : index
    %136 = memref.load %arg3[%c33] : memref<36xf32, #tpu.memory_space<smem>>
    %137 = vector.broadcast %136 : f32 to vector<1x256xf32>
    %138 = arith.mulf %9, %137 : vector<1x256xf32>
    %139 = arith.addf %135, %138 : vector<1x256xf32>
    %c241_i32 = arith.constant 241 : i32
    %140 = tpu.dynamic_rotate %139 by %c241_i32 dim 1 : vector<1x256xf32>, i32 -> vector<1x256xf32>
    %141 = vector.extract_strided_slice %1 {offsets = [6, 0], sizes = [1, 256], strides = [1, 1]} : vector<9x256xf32> to vector<1x256xf32>
    %142 = arith.mulf %140, %141 : vector<1x256xf32>
    %143 = arith.addf %124, %142 : vector<1x256xf32>
    %c7 = arith.constant 7 : index
    %144 = memref.load %arg3[%c7] : memref<36xf32, #tpu.memory_space<smem>>
    %145 = vector.broadcast %144 : f32 to vector<1x256xf32>
    %146 = arith.mulf %3, %145 : vector<1x256xf32>
    %c16 = arith.constant 16 : index
    %147 = memref.load %arg3[%c16] : memref<36xf32, #tpu.memory_space<smem>>
    %148 = vector.broadcast %147 : f32 to vector<1x256xf32>
    %149 = arith.mulf %5, %148 : vector<1x256xf32>
    %150 = arith.addf %146, %149 : vector<1x256xf32>
    %c25 = arith.constant 25 : index
    %151 = memref.load %arg3[%c25] : memref<36xf32, #tpu.memory_space<smem>>
    %152 = vector.broadcast %151 : f32 to vector<1x256xf32>
    %153 = arith.mulf %7, %152 : vector<1x256xf32>
    %154 = arith.addf %150, %153 : vector<1x256xf32>
    %c34 = arith.constant 34 : index
    %155 = memref.load %arg3[%c34] : memref<36xf32, #tpu.memory_space<smem>>
    %156 = vector.broadcast %155 : f32 to vector<1x256xf32>
    %157 = arith.mulf %9, %156 : vector<1x256xf32>
    %158 = arith.addf %154, %157 : vector<1x256xf32>
    %c240_i32 = arith.constant 240 : i32
    %159 = tpu.dynamic_rotate %158 by %c240_i32 dim 1 : vector<1x256xf32>, i32 -> vector<1x256xf32>
    %160 = vector.extract_strided_slice %1 {offsets = [7, 0], sizes = [1, 256], strides = [1, 1]} : vector<9x256xf32> to vector<1x256xf32>
    %161 = arith.mulf %159, %160 : vector<1x256xf32>
    %162 = arith.addf %143, %161 : vector<1x256xf32>
    %c8 = arith.constant 8 : index
    %163 = memref.load %arg3[%c8] : memref<36xf32, #tpu.memory_space<smem>>
    %164 = vector.broadcast %163 : f32 to vector<1x256xf32>
    %165 = arith.mulf %3, %164 : vector<1x256xf32>
    %c17 = arith.constant 17 : index
    %166 = memref.load %arg3[%c17] : memref<36xf32, #tpu.memory_space<smem>>
    %167 = vector.broadcast %166 : f32 to vector<1x256xf32>
    %168 = arith.mulf %5, %167 : vector<1x256xf32>
    %169 = arith.addf %165, %168 : vector<1x256xf32>
    %c26 = arith.constant 26 : index
    %170 = memref.load %arg3[%c26] : memref<36xf32, #tpu.memory_space<smem>>
    %171 = vector.broadcast %170 : f32 to vector<1x256xf32>
    %172 = arith.mulf %7, %171 : vector<1x256xf32>
    %173 = arith.addf %169, %172 : vector<1x256xf32>
    %c35 = arith.constant 35 : index
    %174 = memref.load %arg3[%c35] : memref<36xf32, #tpu.memory_space<smem>>
    %175 = vector.broadcast %174 : f32 to vector<1x256xf32>
    %176 = arith.mulf %9, %175 : vector<1x256xf32>
    %177 = arith.addf %173, %176 : vector<1x256xf32>
    %c239_i32 = arith.constant 239 : i32
    %178 = tpu.dynamic_rotate %177 by %c239_i32 dim 1 : vector<1x256xf32>, i32 -> vector<1x256xf32>
    %179 = vector.extract_strided_slice %1 {offsets = [8, 0], sizes = [1, 256], strides = [1, 1]} : vector<9x256xf32> to vector<1x256xf32>
    %180 = arith.mulf %178, %179 : vector<1x256xf32>
    %181 = arith.addf %162, %180 : vector<1x256xf32>
    %182 = arith.negf %181 : vector<1x256xf32>
    %183 = math.exp %182 : vector<1x256xf32>
    %cst_6 = arith.constant 1.000000e+00 : f32
    %184 = vector.broadcast %cst_6 : f32 to vector<1x256xf32>
    %185 = arith.addf %184, %183 : vector<1x256xf32>
    %186 = arith.divf %184, %185 : vector<1x256xf32>
    %cst_7 = arith.constant 5.000000e-01 : f32
    %187 = vector.broadcast %cst_7 : f32 to vector<1x256xf32>
    %188 = arith.mulf %186, %187 : vector<1x256xf32>
    %cst_8 = arith.constant 5.000000e-01 : f32
    %189 = vector.broadcast %cst_8 : f32 to vector<1x256xf32>
    %190 = arith.addf %188, %189 : vector<1x256xf32>
    %191 = vector.shape_cast %190 : vector<1x256xf32> to vector<1x1x256xf32>
    %192 = vector.broadcast %191 : vector<1x1x256xf32> to vector<1x4x256xf32>
    %193 = arith.mulf %0, %192 : vector<1x4x256xf32>
    %c0_9 = arith.constant 0 : index
    %c0_10 = arith.constant 0 : index
    %c0_11 = arith.constant 0 : index
    %194 = vector.load %arg5[%c0_9, %c0_10, %c0_11] : memref<1x4x256xf32, #tpu.memory_space<vmem>>, vector<1x4x256xf32>
    tpu.vector_store %arg5[%c0_9, %c0_10, %c0_11], %193 {strides = array<i32>} : memref<1x4x256xf32, #tpu.memory_space<vmem>>, vector<1x4x256xf32>,
    %195 = vector.shape_cast %190 : vector<1x256xf32> to vector<1x1x256xf32>
    %c0_12 = arith.constant 0 : index
    %c0_13 = arith.constant 0 : index
    %c0_14 = arith.constant 0 : index
    %196 = vector.load %arg6[%c0_12, %c0_13, %c0_14] : memref<1x1x256xf32, #tpu.memory_space<vmem>>, vector<1x1x256xf32>
    tpu.vector_store %arg6[%c0_12, %c0_13, %c0_14], %195 {strides = array<i32>} : memref<1x1x256xf32, #tpu.memory_space<vmem>>, vector<1x1x256xf32>,
    return
  }
  func.func @transform_0(%arg0: i32) -> (i32, i32, i32) {
    %c0_i32 = arith.constant 0 : i32
    %c0_i32_0 = arith.constant 0 : i32
    %c0_i32_1 = arith.constant 0 : i32
    return %arg0, %c0_i32, %c0_i32_0 : i32, i32, i32
  }
  func.func @transform_1(%arg0: i32) -> (i32, i32) {
    %c0_i32 = arith.constant 0 : i32
    %c0_i32_0 = arith.constant 0 : i32
    %c0_i32_1 = arith.constant 0 : i32
    return %c0_i32, %c0_i32_0 : i32, i32
  }
  func.func @transform_2(%arg0: i32) -> i32 {
    %c0_i32 = arith.constant 0 : i32
    %c0_i32_0 = arith.constant 0 : i32
    return %c0_i32 : i32
  }
  func.func @transform_3(%arg0: i32) -> i32 {
    %c0_i32 = arith.constant 0 : i32
    %c0_i32_0 = arith.constant 0 : i32
    return %c0_i32 : i32
  }
  func.func @transform_4(%arg0: i32) -> (i32, i32, i32) {
    %c0_i32 = arith.constant 0 : i32
    %c0_i32_0 = arith.constant 0 : i32
    %c0_i32_1 = arith.constant 0 : i32
    return %arg0, %c0_i32, %c0_i32_0 : i32, i32, i32
  }
  func.func @transform_5(%arg0: i32) -> (i32, i32, i32) {
    %c0_i32 = arith.constant 0 : i32
    %c0_i32_0 = arith.constant 0 : i32
    %c0_i32_1 = arith.constant 0 : i32
    return %arg0, %c0_i32, %c0_i32_0 : i32, i32, i32
  }
}

</mosaic_0001>

<bundles_post_ra>
// kernel: tpu_custom_call.1
= control target key start
LH: loop header
LB: loop body
LE: loop exit
PB: predicated region body
PF: predicated region fallthrough
CT: control target
= control target key end

     0   :  { %s1634_s0 = inlined_call_operand.hbm [shape: f32[2,4,256], index: 0, kind: input, shape index: {}]   ;;  %s1635_s1 = inlined_call_operand.hbm [shape: f32[9,256], index: 1, kind: input, shape index: {}]   ;;  %s1636_s2 = inlined_call_operand.vmem [shape: f32[36], index: 2, kind: input, shape index: {}]   ;;  %s1637_s3 = inlined_call_operand.<no memory space> [shape: f32[1], index: 3, kind: input, shape index: {}]   ;;  %s1638_s4 = inlined_call_operand.hbm [shape: f32[2,4,256], index: 4, kind: output, shape index: {0}]   ;;  %s1639_s5 = inlined_call_operand.hbm [shape: f32[2,1,256], index: 5, kind: output, shape index: {1}]  }
   0x1   :  { %11 = sst [smem:[#allocation2]] %s1637_s3 }
   0x2   :  { %12 = vsyncpa [#allocation4], 0 }
   0x3   :  { %14 = vsyncpa [#allocation4 + $0x1], 0 }
   0x4   :  { %15 = vsyncpa [#allocation8], 0 }
   0x5   :  { %16 = vsyncpa [#allocation6], 0 }
   0x6   :  { %17 = vsyncpa [#allocation5], 0 }
   0x7   :  { %19 = vsyncpa [#allocation5 + $0x1], 0 }
   0x8   :  { %20 = vsyncpa [#allocation12], 0 }
   0x9   :  { %22 = vsyncpa [#allocation12 + $0x1], 0  ;;  %s1329_s20 = smov 0   ;;  %s1331_s21 = smov 0  }
   0xa   :  { %s1333_s22 = smov 0   ;;  %s1335_s23 = smov 0  }
   0xb LB: > { %s185_s25 = sshll.u32 %s1635_s1, 4  ;;  %s1353_s26 = sadd.s32 4294967295, %s1282_s23   ;;  %s1282_s23 = sphi %s1335_s23, %s1650_s23   ;;  %s1278_s22 = sphi %s1333_s22, %s1649_s22   ;;  %s1274_s21 = sphi %s1331_s21, %s1648_s21   ;;  %s1270_s20 = sphi %s1329_s20, %s1647_s20   ;;  %s186_s25 = int_to_ptr.hbm [resolvable:$true] %s185_s25 }
   0xc   : > { %p925_p0 = scmp.ge.s32.totalorder %s1282_s23, 1  ;;  %p49_p1 = scmp.eq.s32.totalorder %s1353_s26, 0 }
   0xd   : > { %p174_p2 = scmp.lt.s32.totalorder %s1282_s23, 3  ;;  %s1284_s28 = smov [#allocation7]  }
   0xe   : > { %s187_s29 = sshll.u32 %s1284_s28, 4  ;;  %s200_s7 = sshll.u32 %s1636_s2, 4  ;;  %s188_s29 = int_to_ptr.vmem [resolvable:$true] %s187_s29  ;;  %s201_s7 = int_to_ptr.vmem [resolvable:$true] %s200_s7 }
   0xf   : > { %p1358_p3 = pnand %p925_p0, %p174_p2  ;;  %s1285_s8 = smov 256  }
  0x10   : > { %s1286_s9 = smov 16   ;;  %s1287_s10 = smov [#allocation9]  }
  0x11   : > { %p1025_p4 = pneg %p1358_p3  ;;  %s924_s11 = sadd.s32 4294967294, %s1282_s23  }
  0x12   : > { %s1372_s12 = sadd.s32 1, %s1282_s23   ;;  %s35_s14 = sadd.s32 1, %s1278_s22 }
  0x13   : > { %p1026_p6 = pnand %p1025_p4, %p49_p1  ;;  %s32_s13 = ssub.s32 %s1282_s23, %s1372_s12 }
  0x14   : > { %p33_p7 = scmp.eq.s32.totalorder %s32_s13, 0  ;;  %p42_p8 = scmp.ne.s32.totalorder %s1278_s22, %s1274_s21 }
  0x15   : > { %1028 = dma.hbm_to_vmem [thread:$0]  (!%p1026_p6), %s186_s25, 512, %s188_s29, [#allocation8], %s1285_s8, %s1285_s8, %s1286_s9  }
  0x16   : > { %1031 = dma.vmem_to_smem (!%p1026_p6), %s201_s7, 16, %s1287_s10, [#allocation6]  }
  0x17   : > { %p43_p9 = scmp.eq.s32.totalorder %s1282_s23, 0  ;;  %p48_p10 = scmp.ne.s32.totalorder %s1274_s21, %s1270_s20 }
  0x18   : > { %s1383_s15 = scalar_select %p33_p7, %s1278_s22, %s35_s14  }
  0x19   : > { %p1385_p11 = por %p43_p9, %p42_p8  ;;  %p1391_p12 = por %p49_p1, %p48_p10 }
  0x1a   : > { %p135_p13 = scmp.eq.s32.totalorder %s1353_s26, 1  ;;  %p141_p0 = scmp.eq.s32.totalorder %s924_s11, 1 }
  0x1b   : > { %p1045_p2 = scmp.lt.s32.totalorder %s1282_s23, 2  ;;  %s214_s18 = sand.u32 1, %s1278_s22  }
  0x1c   : > { %p1398_p4 = por %p135_p13, %p42_p8  ;;  %p1402_p6 = por %p141_p0, %p48_p10 }
  0x1d   : > { %s929_s24 = sshll.u32 %s214_s18, 3  ;;  %s1009_s25 = sshll.u32 %s1282_s23, 3 }
  0x1e   : > { %s223_s30 = scalar_lea.hbm %s1634_s0, %s1009_s25  ;;  %s218_s6 = scalar_lea.vmem [#allocation3], %s929_s24 }
  0x1f   : > { %s227_s7 = sshll.u32 %s218_s6, 4  ;;  %s225_s8 = sshll.u32 %s223_s30, 4  ;;  %s228_s7 = int_to_ptr.vmem [resolvable:$true] %s227_s7  ;;  %s226_s8 = int_to_ptr.hbm [resolvable:$true] %s225_s8 }
  0x20   : > { %p1412_p7 = pnand %p1045_p2, %p1385_p11  ;;  %s215_s10 = scalar_lea.sflag [#allocation4], %s214_s18 }
  0x21   : > { %s1146_s11 = sshra.s32 %s226_s8, 4  ;;  %s1153_s25 = scalar_lea.hbm %s1634_s0, 16  ;;  %s1147_s11 = int_to_ptr.hbm [resolvable:$true] %s1146_s11 }
  0x22   : > { %s1148_s13 = scalar_lea.hbm %s1147_s11, 8  ;;  %p1150_p9 = pneg %p1412_p7 }
  0x23   : > { %p1149_p8 = scmp.ne.s32.totalorder %s1147_s11, %s1148_s13  ;;  %p1154_p11 = scmp.lt.s32.totalorder %s1147_s11, %s1634_s0 }
  0x24   : > { %p1155_p0 = scmp.lt.s32.totalorder %s1153_s25, %s1148_s13 }
  0x25   : > { %p1151_p10 = pnand %p1150_p9, %p1149_p8 }
  0x26   : > { %p1156_p2 = por %p1155_p0, %p1154_p11 }
  0x27   : > { %p1152_p13 = pneg %p1151_p10 }
  0x29   : > { %p1157_p5 = pnand %p1156_p2, %p1152_p13 }
  0x2b   : > { %1160 = shalt.err (!%p1157_p5)
}
  0x2c   : > { %1035 = dma.hbm_to_vmem [thread:$0]  (!%p1412_p7), %s226_s8, 128, %s228_s7, %s215_s10  }
  0x2d   : > { %236 = sbr.rel (%p1358_p3) target bundleno = 293 (0x125), region = 36  ;;  %s1429_s18 = sand.u32 (!%p1358_p3), 1, %s1274_s21  }
  0x2e   : > { %s933_s29 = sshll.u32 (!%p1358_p3), %s1429_s18, 3  ;;  %s239_s30 = scalar_lea.sflag (!%p1358_p3), [#allocation4], %s1429_s18 }
  0x2f   : > { %s242_s6 = scalar_lea.vmem (!%p1358_p3), [#allocation3], %s933_s29 }
  0x32   : > { %1249 = dma.done.wait (%p1391_p12), %s239_s30, 128  }
  0x33   : > { %1251 = vsyncadd (%p1391_p12), %s239_s30, 4294967168 }
  0x34   : > { %1253 = dma.done.wait (%p49_p1), [#allocation8], 512  }
  0x35   : > { %1255 = vsyncadd (%p49_p1), [#allocation8], 4294966784 }
  0x36   : > { %1257 = dma.done.wait (%p49_p1), [#allocation6], 16  }
  0x37   : > { %1259 = vsyncadd (%p49_p1), [#allocation6], 4294967280 }
  0x38   : > { %258 = sfence }
  0x39   : > { %s944_s27 = sld [smem:[#allocation9 + $0x1]]  ;;  %v1447_v0 = vld [vmem:[%s242_s6] sm:$0xff] }
  0x3a   : > { %s945_s7 = sld [smem:[#allocation9 + $0xa]] }
  0x3b   : > { %s947_s8 = sld [smem:[#allocation9 + $0x13]] }
  0x3c   : > { %s949_s9 = sld [smem:[#allocation9 + $0x1c]] }
  0x3d   : > { %s294_s10 = sld [smem:[#allocation9]] }
  0x3e   : > { %s938_s17 = sld [smem:[#allocation9 + $0x9]] }
  0x3f   : > { %v340_v1 = vstv %s944_s27  ;;  %s940_s11 = sld [smem:[#allocation9 + $0x12]] }
  0x40   : > { %v343_v2 = vstv %s945_s7  ;;  %s942_s13 = sld [smem:[#allocation9 + $0x1b]]  ;;  %v341_v3 = vmul.f32 %v340_v1, %v1447_v0 }
  0x41   : > { %v344_v4 = vmul.f32 %v343_v2, %v1447_v0  ;;  %v351_v5 = vstv %s947_s8  ;;  %s958_s14 = sld [smem:[#allocation9 + $0x3]] }
  0x42   : > { %v352_v6 = vmul.f32 %v351_v5, %v1447_v0  ;;  %v359_v7 = vstv %s949_s9  ;;  %s959_s24 = sld [smem:[#allocation9 + $0xc]] }
  0x43   : > { %v946_v8 = vrot.slane %v344_v4, 9  ;;  %v360_v9 = vmul.f32 %v359_v7, %v1447_v0  ;;  %v295_v10 = vstv %s294_s10  ;;  %s1453_s25 = sld [smem:[#allocation9 + $0x15]] }
  0x44   : > { %v948_v11 = vrot.slane %v352_v6, 10  ;;  %v296_v12 = vmul.f32 %v295_v10, %v1447_v0  ;;  %v298_v13 = vstv %s938_s17  ;;  %s1456_s28 = sld [smem:[#allocation9 + $0x1e]]  ;;  %s1288_s17 = smov 16  }
  0x45   : > { %v349_v14 = vadd.f32 %v946_v8, %v341_v3  ;;  %v950_v15 = vrot.slane %v360_v9, 11  ;;  %v299_v16 = vmul.f32 %v298_v13, %v1447_v0  ;;  %v306_v17 = vstv %s940_s11  ;;  %s1459_s16 = sld [smem:[#allocation9 + $0x2]] }
  0x46   : > { %v307_v18 = vmul.f32 %v306_v17, %v1447_v0  ;;  %v314_v19 = vstv %s942_s13  ;;  %s1462_s30 = sld [smem:[#allocation9 + $0xb]] }
  0x47   : > { %v357_v20 = vadd.f32 %v948_v11, %v349_v14  ;;  %v939_v21 = vrot.slane %v299_v16, 9  ;;  %v315_v22 = vmul.f32 %v314_v19, %v1447_v0  ;;  %v436_v23 = vstv %s958_s14  ;;  %s1465_s6 = sld [smem:[#allocation9 + $0x14]] }
  0x48   : > { %v941_v24 = vrot.slane %v307_v18, 10  ;;  %v437_v25 = vmul.f32 %v436_v23, %v1447_v0  ;;  %v439_v26 = vstv %s959_s24  ;;  %s1468_s27 = sld [smem:[#allocation9 + $0x1d]] }
  0x49   : > { %v365_v27 = vadd.f32 %v950_v15, %v357_v20  ;;  %v304_v28 = vadd.f32 %v939_v21, %v296_v12  ;;  %v943_v29 = vrot.slane %v315_v22, 11  ;;  %v440_v30 = vmul.f32 %v439_v26, %v1447_v0  ;;  %s1471_s7 = sld [smem:[#allocation9 + $0x6]] }
  0x4a   : > { %v447_v31 = vstv %s1453_s25  ;;  %v455_v32 = vstv %s1456_s28  ;;  %s1475_s8 = sld [smem:[#allocation9 + $0xf]]  ;;  %s1289_s25 = smov 17  }
  0x4b   : > { %v367_v33 = vperm.slane %v365_v27, 0  ;;  %v312_v34 = vadd.f32 %v941_v24, %v304_v28  ;;  %v960_v35 = vrot.slane %v440_v30, 9  ;;  %s1477_s9 = sld [smem:[#allocation9 + $0x18]]  ;;  %v448_v36 = vmul.f32 %v447_v31, %v1447_v0 }
  0x4c   : > { %v456_v37 = vmul.f32 %v455_v32, %v1447_v0  ;;  %v389_v38 = vstv %s1459_s16  ;;  %v392_v39 = vstv %s1462_s30  ;;  %s1483_s10 = sld [smem:[#allocation9 + $0x21]]  ;;  %v368_v44 = vperm.slane %v365_v27, 4 }
  0x4d   : > { %371 = vrot.lane.b32.xlu1 %v367_v33, %s1288_s17  ;;  %v320_v40 = vadd.f32 %v943_v29, %v312_v34  ;;  %v445_v41 = vadd.f32 %v960_v35, %v437_v25  ;;  %v390_v42 = vmul.f32 %v389_v38, %v1447_v0  ;;  %v393_v43 = vmul.f32 %v392_v39, %v1447_v0  ;;  %s1488_s11 = sld [smem:[#allocation9 + $0x5]] }
  0x4e   : > { %v962_v45 = vrot.slane %v448_v36, 10  ;;  %v400_v46 = vstv %s1465_s6  ;;  %v408_v47 = vstv %s1468_s27  ;;  %s1492_s13 = sld [smem:[#allocation9 + $0xe]]  ;;  %v964_v49 = vrot.slane %v456_v37, 11 }
  0x4f   : > { %v322_v48 = vperm.slane %v320_v40, 0  ;;  %v953_v50 = vrot.slane %v393_v43, 9  ;;  %v401_v51 = vmul.f32 %v400_v46, %v1447_v0  ;;  %s1495_s14 = sld [smem:[#allocation9 + $0x17]]  ;;  %v409_v53 = vmul.f32 %v408_v47, %v1447_v0 }
  0x50   : > { %v453_v52 = vadd.f32 %v962_v45, %v445_v41  ;;  %v564_v54 = vstv %s1471_s7  ;;  %v567_v55 = vstv %s1475_s8  ;;  %s1500_s24 = sld [smem:[#allocation9 + $0x20]]  ;;  %v323_v4 = vperm.slane %v320_v40, 4  ;;  %s1290_s8 = smov 15  }
  0x51   : > { %326 = vrot.lane.b32.xlu0 %v322_v48, %s1289_s25  ;;  %v398_v56 = vadd.f32 %v953_v50, %v390_v42  ;;  %v955_v57 = vrot.slane %v401_v51, 10  ;;  %v565_v58 = vmul.f32 %v564_v54, %v1447_v0  ;;  %v568_v59 = vmul.f32 %v567_v55, %v1447_v0  ;;  %s1505_s28 = sld [smem:[#allocation9 + $0x7]] }
  0x52   : > { %v957_v60 = vrot.slane %v409_v53, 11  ;;  %v575_v61 = vstv %s1477_s9  ;;  %v583_v62 = vstv %s1483_s10  ;;  %s1509_s16 = sld [smem:[#allocation9 + $0x10]]  ;;  %v461_v7 = vadd.f32 %v964_v49, %v453_v52  ;;  %s1291_s10 = smov 1  }
  0x53   : > { %v406_v63 = vadd.f32 %v955_v57, %v398_v56  ;;  %v981_v1 = vrot.slane %v568_v59, 9  ;;  %v576_v2 = vmul.f32 %v575_v61, %v1447_v0  ;;  %v584_v3 = vmul.f32 %v583_v62, %v1447_v0  ;;  %s1513_s30 = sld [smem:[#allocation9 + $0x19]] }
  0x54   : > { %v517_v5 = vstv %s1488_s11  ;;  %v520_v6 = vstv %s1492_s13  ;;  %s1517_s6 = sld [smem:[#allocation9 + $0x22]]  ;;  %v464_v22 = vperm.slane %v461_v7, 4  ;;  %v463_v31 = vperm.slane %v461_v7, 0  ;;  %s1292_s11 = smov 113  }
  0x55   : > { %373 = vrot.lane.b32.xlu1 %v368_v44, %s1288_s17  ;;  %v414_v8 = vadd.f32 %v957_v60, %v406_v63  ;;  %v573_v9 = vadd.f32 %v981_v1, %v565_v58  ;;  %v983_v10 = vrot.slane %v576_v2, 10  ;;  %v518_v11 = vmul.f32 %v517_v5, %v1447_v0  ;;  %s1524_s27 = sld [smem:[#allocation9 + $0x11]]  ;;  %s1293_s13 = smov 127  }
  0x56   : > { %v521_v12 = vmul.f32 %v520_v6, %v1447_v0  ;;  %v528_v13 = vstv %s1495_s14  ;;  %v536_v14 = vstv %s1500_s24  ;;  %v985_v16 = vrot.slane %v584_v3, 11  ;;  %s1529_s7 = sld [smem:[#allocation9 + $0x8]]  ;;  %s1294_s14 = smov 112  }
  0x57   : > { %v416_v15 = vperm.slane %v414_v8, 0  ;;  %v529_v17 = vmul.f32 %v528_v13, %v1447_v0  ;;  %v581_v18 = vadd.f32 %v983_v10, %v573_v9  ;;  %v611_v20 = vstv %s1505_s28  ;;  %s996_s9 = sld [smem:[#allocation9 + $0x1a]]  ;;  %s1295_s24 = smov 111  }
  0x58   : > { %v974_v19 = vrot.slane %v521_v12, 9  ;;  %v614_v21 = vstv %s1509_s16  ;;  %v537_v24 = vmul.f32 %v536_v14, %v1447_v0  ;;  %v612_v25 = vmul.f32 %v611_v20, %v1447_v0  ;;  %s998_s17 = sld [smem:[#allocation9 + $0x23]] }
  0x59   : > { %328 = vrot.lane.b32.xlu0 %v323_v4, %s1289_s25  ;;  %420 = vrot.lane.b32.xlu2 %v416_v15, %s1290_s8  ;;  %v976_v23 = vrot.slane %v529_v17, 10  ;;  %v615_v27 = vmul.f32 %v614_v21, %v1447_v0  ;;  %v622_v28 = vstv %s1513_s30  ;;  %v589_v32 = vadd.f32 %v985_v16, %v581_v18  ;;  %s966_s25 = sld [smem:[#allocation9 + $0xd]] }
  0x5a   : > { %v526_v26 = vadd.f32 %v974_v19, %v518_v11  ;;  %v630_v29 = vstv %s1517_s6  ;;  %v623_v30 = vmul.f32 %v622_v28, %v1447_v0  ;;  %v978_v36 = vrot.slane %v537_v24, 11  ;;  %s965_s28 = sld [smem:[#allocation9 + $0x4]] }
  0x5b   : > { %v988_v33 = vrot.slane %v615_v27, 9  ;;  %v631_v34 = vmul.f32 %v630_v29, %v1447_v0  ;;  %v417_v37 = vperm.slane %v414_v8, 4  ;;  %v661_v40 = vstv %s1524_s27  ;;  %s968_s16 = sld [smem:[#allocation9 + $0x16]]  ;;  %s1006_s27 = sshll.u32 %s1353_s26, 1 }
  0x5c   : > { %v534_v35 = vadd.f32 %v976_v23, %v526_v26  ;;  %v990_v38 = vrot.slane %v623_v30, 10  ;;  %v591_v41 = vperm.slane %v589_v32, 0  ;;  %v658_v43 = vstv %s1529_s7  ;;  %s970_s30 = sld [smem:[#allocation9 + $0x1f]]  ;;  %v1554_v23 = vld [vmem:[#allocation7 + $0x8] sm:$0xff]  ;;  %s937_s7 = sshll.u32 %s1429_s18, 1 }
  0x5d   : > { %469 = vrot.lane.b32.xlu1 %v464_v22, %s1291_s10  ;;  %v620_v39 = vadd.f32 %v988_v33, %v612_v25  ;;  %v992_v42 = vrot.slane %v631_v34, 11  ;;  %v662_v46 = vmul.f32 %v661_v40, %v1447_v0  ;;  %v669_v47 = vstv %s996_s9  ;;  %s291_s6 = sld [smem:[#allocation2]]  ;;  %v1552_v22 = vld [vmem:[#allocation7] sm:$0xff] }
  0x5e   : > { %v542_v44 = vadd.f32 %v978_v36, %v534_v35  ;;  %v659_v48 = vmul.f32 %v658_v43, %v1447_v0  ;;  %v670_v49 = vmul.f32 %v669_v47, %v1447_v0  ;;  %v677_v54 = vstv %s998_s17  ;;  %s1010_s17 = sshll.u32 %s1353_s26, 3  ;;  %s278_s26 = scalar_lea.vmem [#allocation10], %s933_s29 }
  0x5f   : > { %v628_v45 = vadd.f32 %v990_v38, %v620_v39  ;;  %v995_v52 = vrot.slane %v662_v46, 9  ;;  %v678_v58 = vmul.f32 %v677_v54, %v1447_v0  ;;  %v592_v62 = vperm.slane %v589_v32, 4 }
  0x60   : > { %v545_v50 = vperm.slane %v542_v44, 4  ;;  %v544_v53 = vperm.slane %v542_v44, 0  ;;  %v997_v57 = vrot.slane %v670_v49, 10  ;;  %v330_v6 = vlaneseq }
  0x61   : > { %467 = vrot.lane.b32.xlu0 %v463_v31, %s1291_s10  ;;  %422 = vrot.lane.b32.xlu2 %v417_v37, %s1290_s8  ;;  %v636_v51 = vadd.f32 %v992_v42, %v628_v45  ;;  %v667_v56 = vadd.f32 %v995_v52, %v659_v48  ;;  %v999_v61 = vrot.slane %v678_v58, 11  ;;  %v486_v9 = vstv %s966_s25  ;;  %s794_s10 = scalar_lea.hbm %s1639_s5, %s1006_s27 }
  0x62   : > { %v1546_v8 = vand.u32 127, %v330_v6  ;;  %v483_v11 = vstv %s965_s28  ;;  %v487_v12 = vmul.f32 %v486_v9, %v1447_v0  ;;  %v494_v13 = vstv %s968_s16  ;;  %s1587_s28 = scalar_lea.hbm %s1638_s4, %s1010_s17  ;;  %s782_s16 = sshll.u32 %s278_s26, 4  ;;  %s783_s16 = int_to_ptr.vmem [resolvable:$true] %s782_s16 }
  0x63   : > { %v639_v55 = vperm.slane %v636_v51, 4  ;;  %v638_v59 = vperm.slane %v636_v51, 0  ;;  %v675_v60 = vadd.f32 %v997_v57, %v667_v56  ;;  %v484_v16 = vmul.f32 %v483_v11, %v1447_v0 }
  0x64   : > { %vm332_vm0 = vcmp.lt.s32.totalorder %v1546_v8, 17  ;;  %v967_v19 = vrot.slane %v487_v12, 9  ;;  %v495_v20 = vmul.f32 %v494_v13, %v1447_v0  ;;  %v502_v21 = vstv %s970_s30  ;;  %s784_s30 = sshll.u32 %s1587_s28, 4  ;;  %s785_s30 = int_to_ptr.hbm [resolvable:$true] %s784_s30 }
  0x65   : > { %595 = vrot.lane.b32.xlu1 %v591_v41, %s1292_s11  ;;  %v683_v63 = vadd.f32 %v999_v61, %v675_v60  ;;  %vm375_vm1 = vcmp.lt.s32.totalorder %v1546_v8, 16  ;;  %v292_v27 = vstv %s291_s6  ;;  %v503_v30 = vmul.f32 %v502_v21, %v1447_v0  ;;  %s769_s6 = scalar_lea.sflag [#allocation12], %s1429_s18 }
  0x66   : > { %v492_v28 = vadd.f32 %v967_v19, %v484_v16  ;;  %v969_v29 = vrot.slane %v495_v20, 10  ;;  %v380_v31 = vrot.slane %v1552_v22, 1  ;;  %v381_v32 = vrot.slane %v1554_v23, 1 }
  0x67   : > { %v686_v1 = vperm.slane %v683_v63, 4  ;;  %v685_v2 = vperm.slane %v683_v63, 0  ;;  %vm424_vm2 = vcmp.lt.s32.totalorder %v1546_v8, 15  ;;  %vm471_vm3 = vcmp.lt.s32.totalorder %v1546_v8, 1 }
  0x68   : > { %v427_v38 = vrot.slane %v1552_v22, 2  ;;  %v428_v39 = vrot.slane %v1554_v23, 2  ;;  %v500_v40 = vadd.f32 %v969_v29, %v492_v28  ;;  %v971_v41 = vrot.slane %v503_v30, 11 }
  0x69   : > { %550 = vrot.lane.b32.xlu0 %v545_v50, %s1293_s13  ;;  %548 = vrot.lane.b32.xlu2 %v544_v53, %s1293_s13  ;;  %v474_v44 = vrot.slane %v1552_v22, 3  ;;  %v475_v45 = vrot.slane %v1554_v23, 3  ;;  %vm552_vm4 = vcmp.lt.s32.totalorder %v1546_v8, 127  ;;  %v555_v61 = vrot.slane %v1552_v22, 5 }
  0x6a   : > { %v508_v54 = vadd.f32 %v971_v41, %v500_v40  ;;  %vm599_vm5 = vcmp.lt.s32.totalorder %v1546_v8, 113  ;;  %v602_v9 = vrot.slane %v1552_v22, 6  ;;  %v603_v12 = vrot.slane %v1554_v23, 6 }
  0x6b   : > { %vm646_vm6 = vcmp.lt.s32.totalorder %v1546_v8, 112  ;;  %v649_v19 = vrot.slane %v1552_v22, 7  ;;  %v650_v20 = vrot.slane %v1554_v23, 7  ;;  %vm693_vm7 = vcmp.lt.s32.totalorder %v1546_v8, 111 }
  0x6c   : > { %v510_v63 = vperm.slane %v508_v54, 0 }
  0x6d   : > { %644 = vrot.lane.b32.xlu1 %v639_v55, %s1294_s14 }
  0x71   : > { %642 = vrot.lane.b32.xlu0 %v638_v59, %s1294_s14  ;;  %597 = vrot.lane.b32.xlu2 %v592_v62, %s1292_s11  ;;  %v556_v62 = vrot.slane %v1554_v23, 5  ;;  %s285_s11 = scalar_lea.vmem [#allocation11], %s937_s7  ;;  %s798_s14 = sshll.u32 %s794_s10, 4  ;;  %s799_s14 = int_to_ptr.hbm [resolvable:$true] %s798_s14 }
  0x72   : > { %s796_s13 = sshll.u32 %s285_s11, 4  ;;  %s1190_s27 = sshra.s32 %s799_s14, 4  ;;  %s797_s13 = int_to_ptr.vmem [resolvable:$true] %s796_s13  ;;  %s1191_s27 = int_to_ptr.hbm [resolvable:$true] %s1190_s27 }
  0x73   : > { %s1192_s7 = scalar_lea.hbm %s1191_s27, 2  ;;  %s1196_s10 = scalar_lea.hbm %s1639_s5, 4 }
  0x74   : > { %p1193_p1 = scmp.ne.s32.totalorder %s1191_s27, %s1192_s7  ;;  %p1197_p12 = scmp.lt.s32.totalorder %s1191_s27, %s1639_s5 }
  0x75   : > { %p1198_p7 = scmp.lt.s32.totalorder %s1196_s10, %s1192_s7 }
  0x76   : > { %p1194_p3 = pnand %p1193_p1, %p1398_p4 }
  0x77   : > { %p1199_p8 = por %p1198_p7, %p1197_p12 }
  0x78   : > { %p1195_p5 = pneg %p1194_p3 }
  0x79   : > { %691 = vrot.lane.b32.xlu0 %v686_v1, %s1295_s24  ;;  %689 = vrot.lane.b32.xlu2 %v685_v2, %s1295_s24 }
  0x7a   : > { %p1200_p9 = pnand %p1199_p8, %p1195_p5 }
  0xb3   : > { %v421_v5 = vpop.permute.xlu2 %420 }
  0xbb   : > { %v423_v14 = vpop.permute.xlu2 %422 }
  0xbc   : > { %v425_v47 = vsel %vm424_vm2, %v421_v5, %v423_v14  ;;  %v426_v48 = vsel %vm424_vm2, %v423_v14, %v421_v5  ;;  %v511_v5 = vperm.slane %v508_v54, 4  ;;  %vm747_vm2 = vcmask 1043456  }
  0xbd   : > { %v431_v55 = vmul.f32 %v427_v38, %v426_v48  ;;  %v432_v56 = vmul.f32 %v428_v39, %v425_v47 }
  0xbf   : > { %v372_v3 = vpop.permute.xlu1 %371 }
  0xc3   : > { %v327_v4 = vpop.permute.xlu0 %326  ;;  %v549_v37 = vpop.permute.xlu2 %548 }
  0xc7   : > { %v374_v7 = vpop.permute.xlu1 %373 }
  0xc8   : > { %v376_v33 = vsel %vm375_vm1, %v372_v3, %v374_v7  ;;  %v377_v34 = vsel %vm375_vm1, %v374_v7, %v372_v3  ;;  %vm760_vm1 = vcmp.lt.s32.totalorder %v330_v6, 256 }
  0xc9   : > { %v384_v42 = vmul.f32 %v380_v31, %v377_v34  ;;  %v385_v43 = vmul.f32 %v381_v32, %v376_v33  ;;  %v289_v32 = vld [vmem:[#allocation7 + $0x10] sm:$0x1]  ;;  %v290_v33 = vld [vmem:[#allocation7 + $0x18] sm:$0x1] }
  0xcb   : > { %v329_v10 = vpop.permute.xlu0 %328  ;;  %v598_v7 = vpop.permute.xlu2 %597 }
  0xcc   : > { %v333_v17 = vsel %vm332_vm0, %v327_v4, %v329_v10  ;;  %v334_v18 = vsel %vm332_vm0, %v329_v10, %v327_v4  ;;  %vm755_vm0 = vcmask 1040384  }
  0xcd   : > { %v335_v24 = vmul.f32 %v334_v18, %v1552_v22  ;;  %v336_v25 = vmul.f32 %v333_v17, %v1554_v23 }
  0xcf   : > { %v470_v15 = vpop.permute.xlu1 %469  ;;  %v337_v35 = vadd.f32 %v335_v24, %v292_v27  ;;  %v338_v36 = vadd.f32 %v336_v25, %v292_v27 }
  0xd1   : > { %v386_v51 = vadd.f32 %v384_v42, %v337_v35  ;;  %v387_v52 = vadd.f32 %v385_v43, %v338_v36 }
  0xd3   : > { %v468_v26 = vpop.permute.xlu0 %467  ;;  %v433_v59 = vadd.f32 %v431_v55, %v386_v51  ;;  %v434_v60 = vadd.f32 %v432_v56, %v387_v52  ;;  %v690_v31 = vpop.permute.xlu2 %689 }
  0xd4   : > { %v472_v49 = vsel %vm471_vm3, %v468_v26, %v470_v15  ;;  %v473_v50 = vsel %vm471_vm3, %v470_v15, %v468_v26 }
  0xd5   : > { %v478_v57 = vmul.f32 %v474_v44, %v473_v50  ;;  %v479_v58 = vmul.f32 %v475_v45, %v472_v49 }
  0xd7   : > { %v596_v46 = vpop.permute.xlu1 %595  ;;  %v480_v3 = vadd.f32 %v478_v57, %v433_v59  ;;  %v481_v4 = vadd.f32 %v479_v58, %v434_v60 }
  0xd8   : > { %v600_v15 = vsel %vm599_vm5, %v596_v46, %v598_v7  ;;  %v601_v16 = vsel %vm599_vm5, %v598_v7, %v596_v46 }
  0xd9   : > { %v514_v17 = vadd.f32 %v510_v63, %v480_v3  ;;  %v515_v18 = vadd.f32 %v511_v5, %v481_v4  ;;  %v606_v27 = vmul.f32 %v602_v9, %v600_v15  ;;  %v607_v28 = vmul.f32 %v603_v12, %v601_v16 }
  0xdb   : > { %v551_v53 = vpop.permute.xlu0 %550 }
  0xdc   : > { %v553_v1 = vsel %vm552_vm4, %v549_v37, %v551_v53  ;;  %v554_v2 = vsel %vm552_vm4, %v551_v53, %v549_v37 }
  0xdd   : > { %v559_v10 = vmul.f32 %v555_v61, %v553_v1  ;;  %v560_v11 = vmul.f32 %v556_v62, %v554_v2 }
  0xdf   : > { %v645_v13 = vpop.permute.xlu1 %644  ;;  %v561_v25 = vadd.f32 %v559_v10, %v514_v17  ;;  %v562_v26 = vadd.f32 %v560_v11, %v515_v18 }
  0xe1   : > { %v608_v34 = vadd.f32 %v606_v27, %v561_v25  ;;  %v609_v35 = vadd.f32 %v607_v28, %v562_v26 }
  0xe3   : > { %v643_v14 = vpop.permute.xlu0 %642 }
  0xe4   : > { %v647_v21 = vsel %vm646_vm6, %v643_v14, %v645_v13  ;;  %v648_v24 = vsel %vm646_vm6, %v645_v13, %v643_v14 }
  0xe5   : > { %v653_v29 = vmul.f32 %v649_v19, %v647_v21  ;;  %v654_v30 = vmul.f32 %v650_v20, %v648_v24 }
  0xe7   : > { %v655_v38 = vadd.f32 %v653_v29, %v608_v34  ;;  %v656_v23 = vadd.f32 %v654_v30, %v609_v35 }
  0xeb   : > { %v692_v36 = vpop.permute.xlu0 %691 }
  0xec   : > { %v694_v37 = vsel %vm693_vm7, %v690_v31, %v692_v36  ;;  %v695_v22 = vsel %vm693_vm7, %v692_v36, %v690_v31 }
  0xed   : > { %v696_v39 = vmul.f32 %v694_v37, %v289_v32  ;;  %v697_v40 = vmul.f32 %v695_v22, %v290_v33 }
  0xef   : > { %v698_v41 = vadd.f32 %v696_v39, %v655_v38  ;;  %v699_v42 = vadd.f32 %v697_v40, %v656_v23 }
  0xf1   : > { %v1000_v43 = vmul.f32 -1.442695, %v698_v41  ;;  %v1001_v44 = vmul.f32 -1.442695, %v699_v42 }
  0xf3   : > { %1093 = vpow2.f32 %v1000_v43 }
  0xf4   : > { %1095 = vpow2.f32 %v1001_v44 }
  0xf9   : > { %v1094_v45 = vpop.eup %1093 }
  0xfa   : > { %v1096_v46 = vpop.eup %1095  ;;  %v706_v8 = vadd.f32 1.0, %v1094_v45 }
  0xfb   : > { %v707_v47 = vadd.f32 1.0, %v1096_v46 }
  0xfc   : > { %1097 = vrcp.f32 %v706_v8  ;;  %v719_v54 = vand.u32 2147483648, %v706_v8  ;;  %v717_v56 = vand.u32 2147483647, %v706_v8  ;;  %vm713_vm10 = vweird.f32 %v706_v8 }
  0xfd   : > { %1099 = vrcp.f32 %v707_v47  ;;  %v734_v57 = vand.u32 2147483648, %v707_v47  ;;  %v732_v59 = vand.u32 2147483647, %v707_v47  ;;  %vm728_vm12 = vweird.f32 %v707_v47 }
  0xfe   : > { %v720_v61 = vor.u32 1.1754944e-38, %v719_v54  ;;  %vm718_vm13 = vcmp.eq.f32.partialorder %v717_v56, 8.507059e+37 }
  0xff   : > { %v735_v1 = vor.u32 1.1754944e-38, %v734_v57  ;;  %vm733_vm15 = vcmp.eq.f32.partialorder %v732_v59, 8.507059e+37 }
 0x102   : > { %v1098_v48 = vpop.eup %1097 }
 0x103   : > { %v1100_v49 = vpop.eup %1099  ;;  %v709_v50 = vmul.f32 %v1098_v48, %v706_v8  ;;  %vm714_vm8 = vweird.f32 %v1098_v48 }
 0x104   : > { %v724_v51 = vmul.f32 %v1100_v49, %v707_v47  ;;  %vm729_vm9 = vweird.f32 %v1100_v49  ;;  %vm715_vm11 = vmor %vm713_vm10, %vm714_vm8 }
 0x105   : > { %v710_v52 = vsub.f32 1.0, %v709_v50  ;;  %vm730_vm14 = vmor %vm728_vm12, %vm729_vm9 }
 0x106   : > { %v725_v53 = vsub.f32 1.0, %v724_v51 }
 0x107   : > { %v711_v55 = vmul.f32 %v1098_v48, %v710_v52 }
 0x108   : > { %v726_v58 = vmul.f32 %v1100_v49, %v725_v53 }
 0x109   : > { %v712_v60 = vadd.f32 %v1098_v48, %v711_v55 }
 0x10a   : > { %v727_v62 = vadd.f32 %v1100_v49, %v726_v58 }
 0x10b   : > { %v716_v63 = vsel %vm715_vm11, %v1098_v48, %v712_v60 }
 0x10c   : > { %v721_v2 = vsel %vm718_vm13, %v720_v61, %v716_v63  ;;  %v731_v3 = vsel %vm730_vm14, %v1100_v49, %v727_v62 }
 0x10d   : > { %v736_v4 = vsel %vm733_vm15, %v735_v1, %v731_v3  ;;  %v738_v5 = vmul.f32 0.5, %v721_v2 }
 0x10e   : > { %v739_v7 = vmul.f32 0.5, %v736_v4 }
 0x10f   : > { %v740_v9 = vadd.f32 0.5, %v738_v5 }
 0x110   : > { %v741_v10 = vadd.f32 0.5, %v739_v7 }
 0x111   : > { %v742_v13 = vperm.slane %v740_v9, 0 }
 0x112   : > { %v743_v11 = vperm.slane %v741_v10, 0  ;;  %v754_v12 = vrot.slane %v741_v10, 7 }
 0x114   : > { %v746_v14 = vrot.slane %v743_v11, 4  ;;  %v756_v15 = vsel %vm755_vm0, %v740_v9, %v754_v12 }
 0x115   : > { %762 = vst.msk [vmem:[%s285_s11] sm:$0x3] %vm760_vm1, %v756_v15 }
 0x116   : > { %v748_v16 = vsel %vm747_vm2, %v742_v13, %v746_v14 }
 0x117   : > { %1203 = shalt.err (!%p1200_p9)
}
 0x118   : > { %1022 = dma.vmem_to_hbm [thread:$0]  (%p1398_p4), %s797_s13, 32, %s799_s14, %s769_s6   ;;  %v750_v6 = vmul.f32 %v748_v16, %v1447_v0 }
 0x119   : > { %s764_s29 = scalar_lea.sflag [#allocation5], %s1429_s18  ;;  %s1218_s11 = sshra.s32 %s785_s30, 4  ;;  %s1219_s11 = int_to_ptr.hbm [resolvable:$true] %s1218_s11 }
 0x11a   : > { %751 = vst [vmem:[%s278_s26] sm:$0xff] %v750_v6  ;;  %s1220_s25 = scalar_lea.hbm %s1219_s11, 8  ;;  %s1224_s7 = scalar_lea.hbm %s1638_s4, 16 }
 0x11b   : > { %p1221_p10 = scmp.ne.s32.totalorder %s1219_s11, %s1220_s25  ;;  %p1225_p0 = scmp.lt.s32.totalorder %s1219_s11, %s1638_s4 }
 0x11c   : > { %p1226_p2 = scmp.lt.s32.totalorder %s1224_s7, %s1220_s25 }
 0x11d   : > { %p1222_p13 = pnand %p1221_p10, %p1398_p4 }
 0x11e   : > { %p1227_p1 = por %p1226_p2, %p1225_p0 }
 0x11f   : > { %p1223_p11 = pneg %p1222_p13 }
 0x121   : > { %p1228_p3 = pnand %p1227_p1, %p1223_p11 }
 0x123   : > { %1231 = shalt.err (!%p1228_p3)
}
 0x124   : > { %1021 = dma.vmem_to_hbm [thread:$0]  (%p1398_p4), %s783_s16, 128, %s785_s30, %s764_s29  }
 0x125 PF: > { %s810_s18 = sand.u32 1, %s1270_s20   ;;  %p1646_p5 = scmp.ge.s32.totalorder %s1282_s23, 2 }
 0x126   : > { %s811_s13 = scalar_lea.sflag [#allocation5], %s810_s18 }
 0x127   : > { %p1037_p12 = pnand %p1646_p5, %p1402_p6 }
 0x129   : > { %p1038_p7 = pneg %p1037_p12 }
 0x12b   : > { %1261 = dma.done.wait (%p1038_p7), %s811_s13, 128  }
 0x12c   : > { %1263 = vsyncadd (%p1038_p7), %s811_s13, 4294967168  ;;  %s821_s14 = scalar_lea.sflag [#allocation12], %s810_s18 }
 0x12d   : > { %1265 = dma.done.wait (%p1038_p7), %s821_s14, 32  }
 0x12e   : > { %1267 = vsyncadd (%p1038_p7), %s821_s14, 4294967264  ;;  %p25_p4 = scmp.ge.s32.totalorder %s1372_s12, 4   ;;  %s1647_s20 = smov %s1274_s21 }
 0x12f   : > { %s1648_s21 = smov %s1278_s22  ;;  %s1649_s22 = smov %s1383_s15 }
 0x130   : > { %s1650_s23 = smov %s1372_s12  ;;  %27 = sbr.rel (!%p25_p4) target bundleno = 11 (0xb), region = 107 }
 0x135   :  { %827 = vsyncpa [#allocation4], 1 }
 0x136   :  { %829 = vsyncpa [#allocation4 + $0x1], 1 }
 0x137   :  { %830 = vsyncpa [#allocation8], 1 }
 0x138   :  { %831 = vsyncpa [#allocation5], 1 }
 0x139   :  { %833 = vsyncpa [#allocation5 + $0x1], 1 }
 0x13a   :  { %834 = vsyncpa [#allocation12], 1 }
 0x13b   :  { %836 = vsyncpa [#allocation12 + $0x1], 1 }
 0x13c   :  { %837 = vsyncpa [#allocation6], 1 }
 0x13d   :  { %839 = vsyncpa [#allocation6 + $0x1], 1 }

</bundles_post_ra>
